<compile_context>
chip_gen: v7x
topology: tpu7x:2x2x1
jax: 0.10.0
libtpu: 0.0.40
codegen_flags: <defaults>
</compile_context>

<pallas_src>
import math

import jax
import jax.numpy as jnp
from jax.experimental import pallas as pl
from jax.experimental.pallas import tpu as pltpu


def _dma_copy_kernel(src_hbm, dst_hbm, sem):
    # Const.forward == materialize the stored constant: one HBM->HBM DMA.
    cp = pltpu.make_async_copy(src_hbm, dst_hbm, sem)
    cp.start()
    cp.wait()


def _hbm_copy(x: jax.Array) -> jax.Array:
    """Duplicate `x` into a fresh HBM buffer with a single direct DMA."""
    return pl.pallas_call(
        _dma_copy_kernel,
        out_shape=jax.ShapeDtypeStruct(x.shape, x.dtype),
        in_specs=[pl.BlockSpec(memory_space=pl.ANY)],   # raw HBM ref, no auto-DMA
        out_specs=pl.BlockSpec(memory_space=pl.ANY),    # raw HBM ref, no auto-DMA
        scratch_shapes=[pltpu.SemaphoreType.DMA(())],
    )(x)


def const_forward(noise: jax.Array, *, copy: bool = True) -> jax.Array:
    """Forward pass of Const.

    copy=False: faithful `.to(same_device)` semantics — return the parameter
                itself, zero HBM traffic (recommended in real use).
    copy=True : produce a fresh buffer via a single direct HBM->HBM DMA
                (the Pallas kernel path; used by default here so the kernel
                actually runs).
    """
    if not copy:
        return noise

    numel = math.prod(noise.shape) if noise.shape else 1
    if numel == 0:
        return noise  # empty parameter: nothing to move

    if noise.ndim == 0:
        # Rank-0 parameter: give the DMA a 1-element 1-D view.
        return jnp.reshape(_hbm_copy(jnp.reshape(noise, (1,))), ())

    return _hbm_copy(noise)


class Const:
    """Mirror of konfai Const: a learned constant returned on every forward."""

    def __init__(self, shape: list[int], std: float, key: jax.Array | None = None):
        if key is None:
            key = jax.random.PRNGKey(0)
        # torch: Parameter(randn(shape) * std)
        # TODO(synk): parameter registration / trainability is framework glue
        # with no Pallas equivalent; stored as a plain device array.
        self.noise = jax.random.normal(key, tuple(shape), dtype=jnp.float32) * std

    def __call__(self, input: jax.Array) -> jax.Array:
        # torch: `return self.noise.to(input.device)` — the input only selects
        # the device; on TPU the parameter is already resident.  The Pallas
        # path materializes it into a fresh buffer with one direct DMA
        # (input values unused, matching the torch forward).
        return const_forward(self.noise, copy=True)


if __name__ == "__main__":
    key = jax.random.PRNGKey(0)
    k_param, k_param2, k_in = jax.random.split(key, 3)

    # Small shapes consistent with the module: the constant matches an
    # NCHW activation of batch=2, channels=4, spatial=16x16.
    shape = [2, 4, 16, 16]
    std = 0.02
    module = Const(shape, std, key=k_param)

    x = jax.random.normal(k_in, (2, 4, 16, 16), dtype=jnp.float32)
    y = jax.block_until_ready(module(x))

    assert y.shape == tuple(shape), y.shape
    assert y.dtype == jnp.float32
    assert bool(jnp.array_equal(y, module.noise))

    # Non-128-divisible element count: now the exact same single-DMA path
    # (no pad / slice extra HBM passes).
    module2 = Const([3, 7, 5], 0.1, key=k_param2)
    y2 = jax.block_until_ready(module2(x))
    assert y2.shape == (3, 7, 5), y2.shape
    assert bool(jnp.array_equal(y2, module2.noise))

    # Zero-copy faithful path (feedback item 1): returns the parameter itself.
    y3 = jax.block_until_ready(const_forward(module.noise, copy=False))
    assert bool(jnp.array_equal(y3, module.noise))

    print("KERNEL_OK")
</pallas_src>

<mosaic_0001>
module attributes {stable_mosaic.version = 11 : i64} {
  func.func @_dma_copy_kernel(%arg0: memref<2x4x16x16xf32, #tpu.memory_space<any>>, %arg1: memref<2x4x16x16xf32, #tpu.memory_space<any>>, %arg2: memref<!tpu.dma_semaphore, #tpu.memory_space<semaphore_mem>>) attributes {dimension_semantics = [], scalar_prefetch = 0 : i64, scratch_operands = 1 : i64, tpu.core_type = #tpu.core_type<tc>} {
    tpu.enqueue_dma source(%arg0 : memref<2x4x16x16xf32, #tpu.memory_space<any>>) target(%arg1 : memref<2x4x16x16xf32, #tpu.memory_space<any>>) target_semaphore(%arg2 : memref<!tpu.dma_semaphore, #tpu.memory_space<semaphore_mem>>)
    tpu.wait_dma2 semaphore(%arg2 : memref<!tpu.dma_semaphore, #tpu.memory_space<semaphore_mem>>) src(%arg0 : memref<2x4x16x16xf32, #tpu.memory_space<any>>) dst(%arg1 : memref<2x4x16x16xf32, #tpu.memory_space<any>>)
    return
  }
}

</mosaic_0001>

<bundles_post_ra>
// kernel: tpu_custom_call.1
= control target key start
LH: loop header
LB: loop body
LE: loop exit
PB: predicated region body
PF: predicated region fallthrough
CT: control target
= control target key end

     0   :  { %s36_s6 = smov [#allocation2]   ;;  %s37_s7 = smov [#allocation3]   ;;  %s55_s0 = inlined_call_operand.hbm [shape: f32[2,4,16,16], index: 0, kind: input, shape index: {}]   ;;  %s56_s1 = inlined_call_operand.hbm [shape: f32[2,4,16,16], index: 1, kind: output, shape index: {}]  }
   0x1   :  { %s38_s8 = smov 0  }
   0x2   :  { %18 = dma.general %s55_s0, 2048, %s56_s1, %s36_s6, %s37_s7, [#allocation4], %s38_s8, 0  }
   0x3   :  { %34 = dma.done.wait [#allocation2], 2048 }
   0x4   :  { %35 = vsyncadd [#allocation2], 4294965248 }
   0x5   :  { %24 = vsyncmov [#allocation2] }
   0x8   :  { %s25_s13 = vpop.sfrf %24 }
   0x9   :  { %p30_p0 = scmp.ne.s32.totalorder %s25_s13, 0 }
   0xb   :  { %29 = shalt.err (%p30_p0)  }

</bundles_post_ra>
